<compile_context>
chip_gen: v7x
topology: tpu7x:2x2x1
jax: 0.10.0
libtpu: 0.0.40
codegen_flags: <defaults>
</compile_context>

<pallas_src>
import functools

import jax
import jax.numpy as jnp
from jax import lax
from jax.experimental import pallas as pl
from jax.experimental.pallas import tpu as pltpu


_A_MAX_SINGLE_D = 1024   # Path A: keep whole D in a single block up to this
_A_TD = 1024             # Path A: D tile when tiling (multiple of 8)
_B_MAX_SINGLE_D = 2048   # Path B: keep whole D in a single block up to this
_B_TK = 2048             # Path B: K tile when tiling (multiple of 128)
_B_TM_CAP = 4096         # Path B: cap on rows/block ((tm,128)-padded buffers, v7x budget)


# --------------------------------------------------------------------------------------
# Generation-aware VMEM budgeting
# --------------------------------------------------------------------------------------
def _vmem_capacity_bytes():
    fn = getattr(pltpu, "get_tpu_info", None)
    if fn is None:
        return None
    try:
        cap = int(getattr(fn(), "vmem_capacity_bytes", 0))
        return cap if cap > 0 else None
    except Exception:
        return None


def _block_budget():
    """Returns (per-input target block bytes, scoped vmem_limit_bytes)."""
    cap = _vmem_capacity_bytes()
    if cap is None:
        return 4 * 1024 * 1024, 48 * 1024 * 1024        # unknown part: conservative
    if cap >= 100 * 1024 * 1024:
        return 8 * 1024 * 1024, 96 * 1024 * 1024        # v5e / v6e class (128 MiB VMEM)
    limit = min(48 * 1024 * 1024, cap * 3 // 4)         # v7x class (64 MiB VMEM)
    return max(2 * 1024 * 1024, limit // 8), limit


# --------------------------------------------------------------------------------------
# Kernels
# --------------------------------------------------------------------------------------
def _cos_simple_kernel(x1_ref, x2_ref, o_ref, *, eps, axis):
    """Whole reduce dim inside the block (Path A single-D or Path B single-K)."""
    # TODO(synk): if v5e bundle dumps show ld/st slot pressure from the f32 upcast of large
    # blocks, split the three sums over D sub-tiles with a fori_loop.
    x1 = x1_ref[...].astype(jnp.float32)
    x2 = x2_ref[...].astype(jnp.float32)
    w12 = jnp.sum(x1 * x2, axis=axis, keepdims=True)
    w1 = jnp.sum(x1 * x1, axis=axis, keepdims=True)
    w2 = jnp.sum(x2 * x2, axis=axis, keepdims=True)
    eps2 = jnp.float32(eps * eps)
    denom = jnp.maximum(w1, eps2) * jnp.maximum(w2, eps2)
    res = w12 * lax.rsqrt(denom)
    o_ref[...] = jnp.broadcast_to(res, o_ref.shape).astype(o_ref.dtype)


def _cos_sublane_acc_kernel(x1_ref, x2_ref, o_ref, w12_ref, w1_ref, w2_ref, *,
                            eps, d_total, td, need_mask):
    """Path A with D tiled on the last grid axis: blocks (tb, td, tl), reduce over axis=1."""
    kd = pl.program_id(2)
    nd = pl.num_programs(2)

    @pl.when(kd == 0)
    def _():
        w12_ref[...] = jnp.zeros_like(w12_ref)
        w1_ref[...] = jnp.zeros_like(w1_ref)
        w2_ref[...] = jnp.zeros_like(w2_ref)

    x1 = x1_ref[...].astype(jnp.float32)
    x2 = x2_ref[...].astype(jnp.float32)

    def _accum(a, b):
        w12_ref[...] += jnp.sum(a * b, axis=1, keepdims=True)
        w1_ref[...] += jnp.sum(a * a, axis=1, keepdims=True)
        w2_ref[...] += jnp.sum(b * b, axis=1, keepdims=True)

    if need_mask:
        # Ragged last D block: only that step pays for the iota/compare/select.
        @pl.when(kd < nd - 1)
        def _():
            _accum(x1, x2)

        @pl.when(kd == nd - 1)
        def _():
            def _mask(a):
                row = kd * td + lax.broadcasted_iota(jnp.int32, a.shape, 1)
                return jnp.where(row < d_total, a, jnp.float32(0.0))
            _accum(_mask(x1), _mask(x2))
    else:
        _accum(x1, x2)

    @pl.when(kd == nd - 1)
    def _():
        eps2 = jnp.float32(eps * eps)
        denom = jnp.maximum(w1_ref[...], eps2) * jnp.maximum(w2_ref[...], eps2)
        o_ref[...] = (w12_ref[...] * lax.rsqrt(denom)).astype(o_ref.dtype)


def _cos_lane_acc_kernel(x1_ref, x2_ref, o_ref, w12_ref, w1_ref, w2_ref, *,
                         eps, d_total, tk, need_mask):
    """Path B with K tiled on the last grid axis: (tm, 128) lane-partial accumulators."""
    k = pl.program_id(1)
    nk = pl.num_programs(1)

    @pl.when(k == 0)
    def _():
        w12_ref[...] = jnp.zeros_like(w12_ref)
        w1_ref[...] = jnp.zeros_like(w1_ref)
        w2_ref[...] = jnp.zeros_like(w2_ref)

    x1 = x1_ref[...].astype(jnp.float32)
    x2 = x2_ref[...].astype(jnp.float32)

    def _accum(a, b):
        # Fold tk lanes into 128-lane partial sums with static lane-group slices
        # (pure VPU adds, no per-step cross-lane XLU reduce, dense scratch stores).
        a12 = w12_ref[...]
        a1 = w1_ref[...]
        a2 = w2_ref[...]
        for g in range(tk // 128):
            sl = slice(g * 128, (g + 1) * 128)
            ag = a[..., sl]
            bg = b[..., sl]
            a12 = a12 + ag * bg
            a1 = a1 + ag * ag
            a2 = a2 + bg * bg
        w12_ref[...] = a12
        w1_ref[...] = a1
        w2_ref[...] = a2

    if need_mask:
        # Ragged last K block: only that step pays for the iota/compare/select.
        @pl.when(k < nk - 1)
        def _():
            _accum(x1, x2)

        @pl.when(k == nk - 1)
        def _():
            def _mask(a):
                col = k * tk + lax.broadcasted_iota(jnp.int32, a.shape, a.ndim - 1)
                return jnp.where(col < d_total, a, jnp.float32(0.0))
            _accum(_mask(x1), _mask(x2))
    else:
        _accum(x1, x2)

    @pl.when(k == nk - 1)
    def _():
        eps2 = jnp.float32(eps * eps)
        w12 = jnp.sum(w12_ref[...], axis=-1, keepdims=True)
        w1 = jnp.sum(w1_ref[...], axis=-1, keepdims=True)
        w2 = jnp.sum(w2_ref[...], axis=-1, keepdims=True)
        denom = jnp.maximum(w1, eps2) * jnp.maximum(w2, eps2)
        o_ref[...] = (w12 * lax.rsqrt(denom)).astype(o_ref.dtype)


# --------------------------------------------------------------------------------------
# Broadcast-aware operand preparation (no HBM materialization for the common cases)
# --------------------------------------------------------------------------------------
def _pad_shape(x, nd):
    if x.ndim == nd:
        return x
    return jnp.reshape(x, (1,) * (nd - x.ndim) + tuple(x.shape))


def _group_mode(xg, bg):
    if tuple(xg) == tuple(bg):
        return "full"
    if all(int(s) == 1 for s in xg):
        return "one"
    return None


def _prep_a(x, bshape, d, B, D, L):
    """Reshape to (Bx, D, Lx) with Bx in {1, B}, Lx in {1, L}; materialize only if mixed."""
    nd = len(bshape)
    x = _pad_shape(x, nd)
    lead, mid, trail = x.shape[:d], int(x.shape[d]), x.shape[d + 1:]
    lm = _group_mode(lead, bshape[:d])
    tmode = _group_mode(trail, bshape[d + 1:])
    if mid != D or lm is None or tmode is None:
        x = jnp.broadcast_to(x, bshape)
        return x.reshape(B, D, L), B, L
    Bx = B if lm == "full" else 1
    Lx = L if tmode == "full" else 1
    return x.reshape(Bx, D, Lx), Bx, Lx


def _prep_b_last(x, bshape, d, M, D):
    """Reduce dim is last: reshape to (Mx, D) with Mx in {1, M}."""
    nd = len(bshape)
    x = _pad_shape(x, nd)
    lead, mid = x.shape[:d], int(x.shape[d])
    lm = _group_mode(lead, bshape[:d])
    if mid != D or lm is None:
        x = jnp.broadcast_to(x, bshape)
        return x.reshape(M, D), M
    Mx = M if lm == "full" else 1
    return x.reshape(Mx, D), Mx


def _prep_b_moved(x, bshape, d, M, D):
    """Small trailing-extent fallback: one-time transpose into (Mx, D) rows."""
    nd = len(bshape)
    x = _pad_shape(x, nd)
    lead, mid, trail = x.shape[:d], int(x.shape[d]), x.shape[d + 1:]
    lm = _group_mode(lead, bshape[:d])
    tmode = _group_mode(trail, bshape[d + 1:])
    if mid == D and lm == "one" and tmode == "one":
        # Fully broadcast over all non-dim axes: a single D vector, no transpose needed.
        return x.reshape(1, D), 1
    x = jnp.broadcast_to(x, bshape)
    x = jnp.moveaxis(x, d, -1)
    return x.reshape(M, D), M


# --------------------------------------------------------------------------------------
# BlockSpec factories (broadcast expressed via the index_map, not via HBM copies)
# --------------------------------------------------------------------------------------
def _a_in_spec(full_b, full_l, tb, tl, td, with_d):
    bs = (tb if full_b else 1, td, tl if full_l else 1)
    if with_d:
        if full_b and full_l:
            im = lambda i, j, kd: (i, kd, j)
        elif full_b:
            im = lambda i, j, kd: (i, kd, 0)
        elif full_l:
            im = lambda i, j, kd: (0, kd, j)
        else:
            im = lambda i, j, kd: (0, kd, 0)
    else:
        if full_b and full_l:
            im = lambda i, j: (i, 0, j)
        elif full_b:
            im = lambda i, j: (i, 0, 0)
        elif full_l:
            im = lambda i, j: (0, 0, j)
        else:
            im = lambda i, j: (0, 0, 0)
    return pl.BlockSpec(bs, im)


def _b_in_spec(full_m, tm, tk, with_k):
    bs = (tm if full_m else 1, tk)
    if with_k:
        im = (lambda i, k: (i, k)) if full_m else (lambda i, k: (0, k))
    else:
        im = (lambda i: (i, 0)) if full_m else (lambda i: (0, 0))
    return pl.BlockSpec(bs, im)


# --------------------------------------------------------------------------------------
# Path drivers
# --------------------------------------------------------------------------------------
def _run_path_a(x1, x2, bshape, d, B, D, L, eps, out_dtype, itemsize,
                target_bytes, vmem_limit):
    x1r, b1x, l1x = _prep_a(x1, bshape, d, B, D, L)
    x2r, b2x, l2x = _prep_a(x2, bshape, d, B, D, L)

    tiled = D > _A_MAX_SINGLE_D
    td = _A_TD if tiled else D
    out_itemsize = jnp.dtype(out_dtype).itemsize

    # Per (b, l) output element: 2 inputs x 2 pipeline buffers of td values, plus the
    # (8,128)-tile-padded output (and scratch) columns.
    per_pair = 4 * td * itemsize + 2 * 8 * out_itemsize + (3 * 8 * 4 if tiled else 0)
    usable = (vmem_limit * 17) // 20
    pairs = min(usable // per_pair, max(1, target_bytes // (td * itemsize)))
    pairs = max(pairs, 128)
    if pairs >= L:
        tl = L
        tb = max(1, min(B, pairs // L))
    else:
        tl = max(128, (pairs // 128) * 128)
        tb = 1

    grid_b = pl.cdiv(B, tb)
    grid_l = pl.cdiv(L, tl)

    if not tiled:
        kernel = functools.partial(_cos_simple_kernel, eps=float(eps), axis=1)
        grid = (grid_b, grid_l)
        in_specs = [_a_in_spec(b1x != 1, l1x != 1, tb, tl, td, False),
                    _a_in_spec(b2x != 1, l2x != 1, tb, tl, td, False)]
        out_spec = pl.BlockSpec((tb, 1, tl), lambda i, j: (i, 0, j))
        scratch = []
        sem = ("parallel", "parallel")
    else:
        grid_d = pl.cdiv(D, td)
        need_mask = (D % td) != 0
        kernel = functools.partial(_cos_sublane_acc_kernel, eps=float(eps),
                                   d_total=D, td=td, need_mask=need_mask)
        grid = (grid_b, grid_l, grid_d)
        in_specs = [_a_in_spec(b1x != 1, l1x != 1, tb, tl, td, True),
                    _a_in_spec(b2x != 1, l2x != 1, tb, tl, td, True)]
        out_spec = pl.BlockSpec((tb, 1, tl), lambda i, j, kd: (i, 0, j))
        scratch = [pltpu.VMEM((tb, 1, tl), jnp.float32)] * 3
        sem = ("parallel", "parallel", "arbitrary")

    return pl.pallas_call(
        kernel,
        out_shape=jax.ShapeDtypeStruct((B, 1, L), out_dtype),
        grid_spec=pltpu.PrefetchScalarGridSpec(
            num_scalar_prefetch=0,
            grid=grid,
            in_specs=in_specs,
            out_specs=out_spec,
            scratch_shapes=scratch,
        ),
        compiler_params=pltpu.CompilerParams(
            dimension_semantics=sem,
            vmem_limit_bytes=vmem_limit,
        ),
    )(x1r, x2r)


def _run_path_b(x1r, x2r, m1x, m2x, M, D, eps, out_dtype, itemsize,
                target_bytes, vmem_limit):
    out_itemsize = jnp.dtype(out_dtype).itemsize
    usable = (vmem_limit * 17) // 20

    if D <= _B_MAX_SINGLE_D:
        tk = D
        per_row = 4 * tk * itemsize + 2 * 128 * out_itemsize
        rows = min(usable // per_row, max(8, target_bytes // (tk * itemsize)), _B_TM_CAP)
        tm = M if rows >= M else max(8, (rows // 8) * 8)
        grid = (pl.cdiv(M, tm),)
        kernel = functools.partial(_cos_simple_kernel, eps=float(eps), axis=-1)
        in_specs = [_b_in_spec(m1x != 1, tm, tk, False),
                    _b_in_spec(m2x != 1, tm, tk, False)]
        out_spec = pl.BlockSpec((tm, 1), lambda i: (i, 0))
        scratch = []
        sem = ("parallel",)
    else:
        tk = _B_TK
        num_k = pl.cdiv(D, tk)
        need_mask = (D % tk) != 0
        per_row = 4 * tk * itemsize + 2 * 128 * out_itemsize + 3 * 128 * 4
        rows = min(usable // per_row, max(8, target_bytes // (tk * itemsize)), _B_TM_CAP)
        tm = M if rows >= M else max(8, (rows // 8) * 8)
        grid = (pl.cdiv(M, tm), num_k)
        kernel = functools.partial(_cos_lane_acc_kernel, eps=float(eps),
                                   d_total=D, tk=tk, need_mask=need_mask)
        in_specs = [_b_in_spec(m1x != 1, tm, tk, True),
                    _b_in_spec(m2x != 1, tm, tk, True)]
        out_spec = pl.BlockSpec((tm, 1), lambda i, k: (i, 0))
        scratch = [pltpu.VMEM((tm, 128), jnp.float32)] * 3
        sem = ("parallel", "arbitrary")

    # NOTE: the (tm, 1) output stays lane-sparse on purpose; output bytes are ~1/D of
    # input bytes, so an in-kernel sublane->lane relayout would not pay for itself.
    return pl.pallas_call(
        kernel,
        out_shape=jax.ShapeDtypeStruct((M, 1), out_dtype),
        grid_spec=pltpu.PrefetchScalarGridSpec(
            num_scalar_prefetch=0,
            grid=grid,
            in_specs=in_specs,
            out_specs=out_spec,
            scratch_shapes=scratch,
        ),
        compiler_params=pltpu.CompilerParams(
            dimension_semantics=sem,
            vmem_limit_bytes=vmem_limit,
        ),
    )(x1r, x2r)


# --------------------------------------------------------------------------------------
# Public API
# --------------------------------------------------------------------------------------
def cosine_similarity(x1, x2, dim=1, eps=1e-8):
    """Pallas TPU implementation of F.cosine_similarity(x1, x2, dim, eps)."""
    x1 = jnp.asarray(x1)
    x2 = jnp.asarray(x2)
    bshape = tuple(int(s) for s in jnp.broadcast_shapes(x1.shape, x2.shape))
    ndim = len(bshape)
    d = dim % ndim
    D = bshape[d]

    out_dtype = jnp.promote_types(x1.dtype, x2.dtype)
    if not jnp.issubdtype(out_dtype, jnp.floating):
        out_dtype = jnp.dtype(jnp.float32)
    itemsize = max(jnp.dtype(x1.dtype).itemsize, jnp.dtype(x2.dtype).itemsize)
    out_shape = tuple(s for i, s in enumerate(bshape) if i != d)

    B = 1
    for s in bshape[:d]:
        B *= s
    L = 1
    for s in bshape[d + 1:]:
        L *= s
    M = B * L

    target_bytes, vmem_limit = _block_budget()

    if d == ndim - 1:
        x1r, m1 = _prep_b_last(x1, bshape, d, M, D)
        x2r, m2 = _prep_b_last(x2, bshape, d, M, D)
        out = _run_path_b(x1r, x2r, m1, m2, M, D, eps, out_dtype, itemsize,
                          target_bytes, vmem_limit)
        return out.reshape(out_shape)

    if L >= 128:
        out = _run_path_a(x1, x2, bshape, d, B, D, L, eps, out_dtype, itemsize,
                          target_bytes, vmem_limit)
        return out.reshape(out_shape)

    # Small trailing extent (< 128 lanes): lane-sparse Path A would run at L/128
    # occupancy; a one-time transpose into lane-reduced Path B is cheaper.
    x1r, m1 = _prep_b_moved(x1, bshape, d, M, D)
    x2r, m2 = _prep_b_moved(x2, bshape, d, M, D)
    out = _run_path_b(x1r, x2r, m1, m2, M, D, eps, out_dtype, itemsize,
                      target_bytes, vmem_limit)
    return out.reshape(out_shape)


class CosineSimilarity:
    """JAX/Pallas port of torch.nn.CosineSimilarity (no parameters)."""

    def __init__(self, dim: int = 1, eps: float = 1e-8):
        self.dim = dim
        self.eps = eps

    def __call__(self, x1, x2):
        return cosine_similarity(x1, x2, self.dim, self.eps)


def _ref_cosine(x1, x2, dim, eps):
    x1 = jnp.asarray(x1).astype(jnp.float32)
    x2 = jnp.asarray(x2).astype(jnp.float32)
    w12 = jnp.sum(x1 * x2, axis=dim)
    w1 = jnp.sum(x1 * x1, axis=dim)
    w2 = jnp.sum(x2 * x2, axis=dim)
    eps2 = jnp.float32(eps * eps)
    return w12 * lax.rsqrt(jnp.maximum(w1, eps2) * jnp.maximum(w2, eps2))


if __name__ == "__main__":
    key = jax.random.PRNGKey(0)
    ks = jax.random.split(key, 12)

    # 1) NCHW, similarity over channels: Path A (D on sublanes, single D block).
    a1 = jax.random.normal(ks[0], (2, 4, 16, 16), dtype=jnp.float32)
    a2 = jax.random.normal(ks[1], (2, 4, 16, 16), dtype=jnp.float32)
    out1 = jax.block_until_ready(CosineSimilarity(dim=1, eps=1e-8)(a1, a2))
    ref1 = _ref_cosine(a1, a2, 1, 1e-8)
    assert out1.shape == (2, 16, 16)
    assert jnp.allclose(out1, ref1, atol=1e-5, rtol=1e-5)

    # 2) Last-dim reduce with D > 2048: Path B, K tiling + ragged mask + lane partials.
    b1 = jax.random.normal(ks[2], (16, 5000), dtype=jnp.float32)
    b2 = jax.random.normal(ks[3], (16, 5000), dtype=jnp.float32)
    out2 = jax.block_until_ready(CosineSimilarity(dim=-1, eps=1e-6)(b1, b2))
    ref2 = _ref_cosine(b1, b2, -1, 1e-6)
    assert out2.shape == (16,)
    assert jnp.allclose(out2, ref2, atol=1e-4, rtol=1e-4)

    # 3) Broadcast: batch of rows vs a single row; the small operand is fed through the
    #    BlockSpec (block index 0) and never materialized at full size in HBM.
    c1 = jax.random.normal(ks[4], (64, 256), dtype=jnp.float32)
    c2 = jax.random.normal(ks[5], (1, 256), dtype=jnp.float32)
    out3 = jax.block_until_ready(CosineSimilarity(dim=1, eps=1e-8)(c1, c2))
    ref3 = _ref_cosine(c1, c2, 1, 1e-8)
    assert out3.shape == (64,)
    assert jnp.allclose(out3, ref3, atol=1e-5, rtol=1e-5)

    # 4) Reduce dim not last with tiny trailing extent (L = 36 < 128): transposed Path B.
    d1 = jax.random.normal(ks[6], (4, 8, 6, 6), dtype=jnp.float32)
    d2 = jax.random.normal(ks[7], (4, 8, 6, 6), dtype=jnp.float32)
    out4 = jax.block_until_ready(CosineSimilarity(dim=1, eps=1e-8)(d1, d2))
    ref4 = _ref_cosine(d1, d2, 1, 1e-8)
    assert out4.shape == (4, 6, 6)
    assert jnp.allclose(out4, ref4, atol=1e-5, rtol=1e-5)

    # 5) Reduce dim not last with large D: Path A with a tiled "arbitrary" D axis + mask
    #    (no wrapper-side moveaxis).
    e1 = jax.random.normal(ks[8], (2, 2500, 128), dtype=jnp.float32)
    e2 = jax.random.normal(ks[9], (2, 2500, 128), dtype=jnp.float32)
    out5 = jax.block_until_ready(CosineSimilarity(dim=1, eps=1e-8)(e1, e2))
    ref5 = _ref_cosine(e1, e2, 1, 1e-8)
    assert out5.shape == (2, 128)
    assert jnp.allclose(out5, ref5, atol=1e-4, rtol=1e-4)

    # 6) Channel-broadcast NCHW operand + bf16 inputs (Path A broadcast blocks, native-width DMA).
    f1 = jax.random.normal(ks[10], (2, 4, 16, 16), dtype=jnp.bfloat16)
    f2 = jax.random.normal(ks[11], (1, 4, 1, 1), dtype=jnp.bfloat16)
    out6 = jax.block_until_ready(CosineSimilarity(dim=1, eps=1e-8)(f1, f2))
    ref6 = _ref_cosine(f1, f2, 1, 1e-8)
    assert out6.shape == (2, 16, 16)
    assert out6.dtype == jnp.bfloat16
    assert jnp.allclose(out6.astype(jnp.float32), ref6, atol=2e-2, rtol=2e-2)

    print("KERNEL_OK")
</pallas_src>

<mosaic_0001>
module attributes {stable_mosaic.version = 11 : i64} {
  func.func @_cos_simple_kernel(%arg0: i32, %arg1: i32, %arg2: memref<2x4x256xf32, #tpu.memory_space<vmem>>, %arg3: memref<2x4x256xf32, #tpu.memory_space<vmem>>, %arg4: memref<2x1x256xf32, #tpu.memory_space<vmem>>) attributes {dimension_semantics = [#tpu.dimension_semantics<parallel>, #tpu.dimension_semantics<parallel>], iteration_bounds = array<i64: 1, 1>, scalar_prefetch = 0 : i64, scratch_operands = 0 : i64, tpu.core_type = #tpu.core_type<tc>, window_params = [{transform_indices = @transform_0, window_bounds = array<i64: 2, 4, 256>}, {transform_indices = @transform_1, window_bounds = array<i64: 2, 4, 256>}, {transform_indices = @transform_2, window_bounds = array<i64: 2, 1, 256>}]} {
    %c0 = arith.constant 0 : index
    %c0_0 = arith.constant 0 : index
    %c0_1 = arith.constant 0 : index
    %0 = vector.load %arg2[%c0, %c0_0, %c0_1] : memref<2x4x256xf32, #tpu.memory_space<vmem>>, vector<2x4x256xf32>
    %c0_2 = arith.constant 0 : index
    %c0_3 = arith.constant 0 : index
    %c0_4 = arith.constant 0 : index
    %1 = vector.load %arg3[%c0_2, %c0_3, %c0_4] : memref<2x4x256xf32, #tpu.memory_space<vmem>>, vector<2x4x256xf32>
    %2 = arith.mulf %0, %1 : vector<2x4x256xf32>
    %cst = arith.constant dense<0.000000e+00> : vector<2x256xf32>
    %3 = vector.multi_reduction <add>, %2, %cst [1] : vector<2x4x256xf32> to vector<2x256xf32>
    %4 = vector.shape_cast %3 : vector<2x256xf32> to vector<2x1x256xf32>
    %5 = arith.mulf %0, %0 : vector<2x4x256xf32>
    %cst_5 = arith.constant dense<0.000000e+00> : vector<2x256xf32>
    %6 = vector.multi_reduction <add>, %5, %cst_5 [1] : vector<2x4x256xf32> to vector<2x256xf32>
    %7 = vector.shape_cast %6 : vector<2x256xf32> to vector<2x1x256xf32>
    %8 = arith.mulf %1, %1 : vector<2x4x256xf32>
    %cst_6 = arith.constant dense<0.000000e+00> : vector<2x256xf32>
    %9 = vector.multi_reduction <add>, %8, %cst_6 [1] : vector<2x4x256xf32> to vector<2x256xf32>
    %10 = vector.shape_cast %9 : vector<2x256xf32> to vector<2x1x256xf32>
    %cst_7 = arith.constant 1.000000e-16 : f32
    %11 = vector.broadcast %cst_7 : f32 to vector<2x1x256xf32>
    %12 = arith.maximumf %7, %11 : vector<2x1x256xf32>
    %cst_8 = arith.constant 1.000000e-16 : f32
    %13 = vector.broadcast %cst_8 : f32 to vector<2x1x256xf32>
    %14 = arith.maximumf %10, %13 : vector<2x1x256xf32>
    %15 = arith.mulf %12, %14 : vector<2x1x256xf32>
    %16 = math.rsqrt %15 : vector<2x1x256xf32>
    %17 = arith.mulf %4, %16 : vector<2x1x256xf32>
    %c0_9 = arith.constant 0 : index
    %c0_10 = arith.constant 0 : index
    %c0_11 = arith.constant 0 : index
    %18 = vector.load %arg4[%c0_9, %c0_10, %c0_11] : memref<2x1x256xf32, #tpu.memory_space<vmem>>, vector<2x1x256xf32>
    tpu.vector_store %arg4[%c0_9, %c0_10, %c0_11], %17 {strides = array<i32>} : memref<2x1x256xf32, #tpu.memory_space<vmem>>, vector<2x1x256xf32>,
    return
  }
  func.func @transform_0(%arg0: i32, %arg1: i32) -> (i32, i32, i32) {
    %c0_i32 = arith.constant 0 : i32
    %c0_i32_0 = arith.constant 0 : i32
    return %arg0, %c0_i32, %arg1 : i32, i32, i32
  }
  func.func @transform_1(%arg0: i32, %arg1: i32) -> (i32, i32, i32) {
    %c0_i32 = arith.constant 0 : i32
    %c0_i32_0 = arith.constant 0 : i32
    return %arg0, %c0_i32, %arg1 : i32, i32, i32
  }
  func.func @transform_2(%arg0: i32, %arg1: i32) -> (i32, i32, i32) {
    %c0_i32 = arith.constant 0 : i32
    %c0_i32_0 = arith.constant 0 : i32
    return %arg0, %c0_i32, %arg1 : i32, i32, i32
  }
}

</mosaic_0001>

<bundles_post_ra>
// kernel: tpu_custom_call.1
= control target key start
LH: loop header
LB: loop body
LE: loop exit
PB: predicated region body
PF: predicated region fallthrough
CT: control target
= control target key end

     0   :  { %7 = vsyncpa [#allocation3], 0  ;;  %s400_s0 = inlined_call_operand.hbm [shape: f32[2,4,256], index: 0, kind: input, shape index: {}]   ;;  %s401_s1 = inlined_call_operand.hbm [shape: f32[2,4,256], index: 1, kind: input, shape index: {}]   ;;  %s402_s2 = inlined_call_operand.hbm [shape: f32[2,1,256], index: 2, kind: output, shape index: {}]  }
   0x1   :  { %8 = vsyncpa [#allocation6], 0 }
   0x2   :  { %9 = vsyncpa [#allocation4], 0  ;;  %s321_s9 = smov [#allocation2]   ;;  %s249_s13 = scalar_lea.hbm %s400_s0, 256 }
   0x3   :  { %s15_s10 = sshll.u32 %s321_s9, 4  ;;  %p250_p0 = scmp.ne.s32.totalorder %s400_s0, %s249_s13  ;;  %s16_s10 = int_to_ptr.vmem [resolvable:$true] %s15_s10 }
   0x4   :  { %p253_p1 = scmp.lt.u32.totalorder %s249_s13, %s400_s0 }
   0x6   :  { %p255_p2 = pnand %p253_p1, %p250_p0 }
   0x8   :  { %258 = shalt.err (!%p255_p2)
}
   0x9   :  { %s259_s18 = scalar_lea.vmem %s16_s10, 256  ;;  %p264_p4 = scmp.lt.s32.totalorder %s16_s10, %s16_s10 }
   0xa   :  { %p260_p3 = scmp.ne.s32.totalorder %s16_s10, %s259_s18  ;;  %p265_p5 = scmp.lt.s32.totalorder %s259_s18, %s259_s18 }
   0xc   :  { %p266_p6 = por %p265_p5, %p264_p4 }
   0xe   :  { %p267_p7 = pnand %p266_p6, %p260_p3 }
  0x10   :  { %270 = shalt.err (!%p267_p7)
}
  0x11   :  { %s322_s19 = smov 128   ;;  %s323_s20 = smov 8  }
  0x12   :  { %21 = dma.hbm_to_vmem [thread:$0]  %s400_s0, 256, %s16_s10, [#allocation3], %s322_s19, %s322_s19, %s323_s20  }
  0x13   :  { %s324_s23 = smov [#allocation5]   ;;  %s271_s27 = scalar_lea.hbm %s401_s1, 256 }
  0x14   :  { %s27_s24 = sshll.u32 %s324_s23, 4  ;;  %p272_p8 = scmp.ne.s32.totalorder %s401_s1, %s271_s27  ;;  %s28_s24 = int_to_ptr.vmem [resolvable:$true] %s27_s24 }
  0x15   :  { %p275_p9 = scmp.lt.u32.totalorder %s271_s27, %s401_s1 }
  0x17   :  { %p277_p10 = pnand %p275_p9, %p272_p8 }
  0x19   :  { %280 = shalt.err (!%p277_p10)
}
  0x1a   :  { %s281_s4 = scalar_lea.vmem %s28_s24, 256  ;;  %p286_p12 = scmp.lt.s32.totalorder %s28_s24, %s28_s24 }
  0x1b   :  { %p282_p11 = scmp.ne.s32.totalorder %s28_s24, %s281_s4  ;;  %p287_p13 = scmp.lt.s32.totalorder %s281_s4, %s281_s4 }
  0x1d   :  { %p288_p0 = por %p287_p13, %p286_p12 }
  0x1f   :  { %p289_p1 = pnand %p288_p0, %p282_p11 }
  0x21   :  { %292 = shalt.err (!%p289_p1)
}
  0x22   :  { %33 = dma.hbm_to_vmem [thread:$0]  %s401_s1, 256, %s28_s24, [#allocation6], %s322_s19, %s322_s19, %s323_s20  }
  0x23   :  { %315 = dma.done.wait [#allocation3], 256  }
  0x24   :  { %316 = vsyncadd [#allocation3], 4294967040 }
  0x25   :  { %317 = dma.done.wait [#allocation6], 256  }
  0x26   :  { %318 = vsyncadd [#allocation6], 4294967040  ;;  %v40_v0 = vld [vmem:[#allocation2] sm:$0xff]  ;;  %v42_v1 = vld [vmem:[#allocation5] sm:$0xff]  ;;  %vm52_vm0 = vcmask 1043456   ;;  %s326_s1 = smov [#allocation7]  }
  0x27   :  { %v44_v2 = vmul.f32 %v42_v1, %v40_v0  ;;  %v81_v3 = vmul.f32 %v40_v0, %v40_v0  ;;  %v117_v4 = vmul.f32 %v42_v1, %v42_v1  ;;  %v41_v23 = vld [vmem:[#allocation2 + $0x8] sm:$0xff]  ;;  %v43_v30 = vld [vmem:[#allocation5 + $0x8] sm:$0xff]  ;;  %s220_s6 = sshll.u32 %s326_s1, 4  ;;  %s221_s6 = int_to_ptr.vmem [resolvable:$true] %s220_s6 }
  0x28   :  { %v82_v33 = vmul.f32 %v41_v23, %v41_v23  ;;  %v45_v36 = vmul.f32 %v43_v30, %v41_v23  ;;  %v118_v40 = vmul.f32 %v43_v30, %v43_v30  ;;  %s293_s7 = scalar_lea.vmem %s221_s6, 64  ;;  %p298_p3 = scmp.lt.s32.totalorder %s221_s6, %s221_s6 }
  0x29   :  { %v85_v5 = vcombine.high %v81_v3, %v81_v3  ;;  %v89_v6 = vsel %vm52_vm0, %v81_v3, 0.0  ;;  %v48_v7 = vcombine.high %v44_v2, %v44_v2  ;;  %v121_v9 = vcombine.high %v117_v4, %v117_v4  ;;  %p294_p2 = scmp.ne.s32.totalorder %s221_s6, %s293_s7  ;;  %p299_p4 = scmp.lt.s32.totalorder %s293_s7, %s293_s7 }
  0x2a   :  { %v90_v8 = vrot.slane %v89_v6, 4  ;;  %v125_v10 = vsel %vm52_vm0, %v117_v4, 0.0  ;;  %v53_v15 = vsel %vm52_vm0, %v44_v2, 0.0  ;;  %v86_v46 = vcombine.high %v82_v33, %v82_v33 }
  0x2b   :  { %v96_v11 = vsel %vm52_vm0, %v85_v5, 0.0  ;;  %v126_v12 = vrot.slane %v125_v10, 4  ;;  %v132_v17 = vsel %vm52_vm0, %v121_v9, 0.0  ;;  %v60_v18 = vsel %vm52_vm0, %v48_v7, 0.0  ;;  %p300_p5 = por %p299_p4, %p298_p3 }
  0x2c   :  { %v91_v13 = vadd.f32 %v90_v8, %v89_v6  ;;  %v97_v14 = vrot.slane %v96_v11, 4  ;;  %v133_v22 = vrot.slane %v132_v17, 4  ;;  %v54_v24 = vrot.slane %v53_v15, 4 }
  0x2d   :  { %v127_v16 = vadd.f32 %v126_v12, %v125_v10  ;;  %v61_v27 = vrot.slane %v60_v18, 4  ;;  %v49_v49 = vcombine.high %v45_v36, %v45_v36  ;;  %v67_v50 = vsel %vm52_vm0, %v45_v36, 0.0  ;;  %p301_p6 = pnand %p300_p5, %p294_p2 }
  0x2e   :  { %v92_v19 = vrot.slane %v91_v13, 2  ;;  %v98_v20 = vadd.f32 %v97_v14, %v96_v11  ;;  %v134_v29 = vadd.f32 %v133_v22, %v132_v17  ;;  %v55_v37 = vadd.f32 %v54_v24, %v53_v15 }
  0x2f   :  { %v128_v21 = vrot.slane %v127_v16, 2  ;;  %v62_v41 = vadd.f32 %v61_v27, %v60_v18  ;;  %v103_v52 = vsel %vm52_vm0, %v82_v33, 0.0  ;;  %v110_v53 = vsel %vm52_vm0, %v86_v46, 0.0 }
  0x30   :  { %v93_v25 = vadd.f32 %v92_v19, %v91_v13  ;;  %v99_v26 = vrot.slane %v98_v20, 2  ;;  %v135_v35 = vrot.slane %v134_v29, 2  ;;  %v56_v51 = vrot.slane %v55_v37, 2 }
  0x31   :  { %v129_v28 = vadd.f32 %v128_v21, %v127_v16  ;;  %v122_v54 = vcombine.high %v118_v40, %v118_v40  ;;  %v63_v55 = vrot.slane %v62_v41, 2  ;;  %v104_v59 = vrot.slane %v103_v52, 4 }
  0x32   :  { %v94_v31 = vrot.slane %v93_v25, 1  ;;  %v100_v32 = vadd.f32 %v99_v26, %v98_v20  ;;  %v136_v43 = vadd.f32 %v135_v35, %v134_v29  ;;  %v111_v60 = vrot.slane %v110_v53, 4 }
  0x33   :  { %v130_v34 = vrot.slane %v129_v28, 1  ;;  %v139_v61 = vsel %vm52_vm0, %v118_v40, 0.0  ;;  %v146_v62 = vsel %vm52_vm0, %v122_v54, 0.0  ;;  %v57_v2 = vadd.f32 %v56_v51, %v55_v37 }
  0x34   :  { %v95_v38 = vadd.f32 %v94_v31, %v93_v25  ;;  %v101_v39 = vrot.slane %v100_v32, 1  ;;  %v137_v47 = vrot.slane %v136_v43, 1  ;;  %v140_v0 = vrot.slane %v139_v61, 4 }
  0x35   :  { %v131_v42 = vadd.f32 %v130_v34, %v129_v28  ;;  %v147_v1 = vrot.slane %v146_v62, 4  ;;  %v74_v3 = vsel %vm52_vm0, %v49_v49, 0.0  ;;  %v105_v4 = vadd.f32 %v104_v59, %v103_v52 }
  0x36   :  { %v102_v44 = vadd.f32 %v101_v39, %v100_v32  ;;  %v153_v45 = vmax.f32 %v95_v38, 1e-16  ;;  %v138_v56 = vadd.f32 %v137_v47, %v136_v43  ;;  %v112_v5 = vadd.f32 %v111_v60, %v110_v53 }
  0x37   :  { %v157_v48 = vmax.f32 %v131_v42, 1e-16  ;;  %v141_v7 = vadd.f32 %v140_v0, %v139_v61  ;;  %v148_v8 = vadd.f32 %v147_v1, %v146_v62  ;;  %v64_v9 = vadd.f32 %v63_v55, %v62_v41 }
  0x38   :  { %v154_v57 = vmax.f32 %v102_v44, 1e-16  ;;  %v158_v63 = vmax.f32 %v138_v56, 1e-16  ;;  %v68_v10 = vrot.slane %v67_v50, 4  ;;  %v106_v11 = vrot.slane %v105_v4, 2 }
  0x39   :  { %v161_v58 = vmul.f32 %v157_v48, %v153_v45  ;;  %v113_v12 = vrot.slane %v112_v5, 2  ;;  %v75_v13 = vrot.slane %v74_v3, 4  ;;  %v142_v14 = vrot.slane %v141_v7, 2 }
  0x3a   :  { %v162_v6 = vmul.f32 %v158_v63, %v154_v57  ;;  %v149_v15 = vrot.slane %v148_v8, 2  ;;  %v58_v16 = vrot.slane %v57_v2, 1  ;;  %v107_v17 = vadd.f32 %v106_v11, %v105_v4 }
  0x3b   :  { %241 = vrsqrt.f32 %v161_v58  ;;  %v114_v18 = vadd.f32 %v113_v12, %v112_v5  ;;  %v325_v19 = vmov 1966171168   ;;  %v181_v21 = vlaneseq }
  0x3c   :  { %243 = vrsqrt.f32 %v162_v6  ;;  %v179_v20 = vunpack.c.l.s4 %v325_v19  ;;  %v143_v22 = vadd.f32 %v142_v14, %v141_v7  ;;  %v150_v23 = vadd.f32 %v149_v15, %v148_v8 }
  0x3d   :  { %v65_v24 = vrot.slane %v64_v9, 1  ;;  %v69_v25 = vadd.f32 %v68_v10, %v67_v50  ;;  %v108_v26 = vrot.slane %v107_v17, 1  ;;  %v115_v27 = vrot.slane %v114_v18, 1 }
  0x3e   :  { %v76_v28 = vadd.f32 %v75_v13, %v74_v3  ;;  %v144_v29 = vrot.slane %v143_v22, 1  ;;  %v151_v30 = vrot.slane %v150_v23, 1  ;;  %v59_v31 = vadd.f32 %v58_v16, %v57_v2 }
  0x3f   :  { %v109_v32 = vadd.f32 %v108_v26, %v107_v17  ;;  %v116_v33 = vadd.f32 %v115_v27, %v114_v18  ;;  %v180_v35 = vunpack.c.0.s8 %v179_v20  ;;  %v182_v36 = vshrl.u32 %v181_v21, 7 }
  0x40   :  { %v145_v37 = vadd.f32 %v144_v29, %v143_v22  ;;  %v152_v38 = vadd.f32 %v151_v30, %v150_v23  ;;  %v66_v39 = vadd.f32 %v65_v24, %v64_v9  ;;  %v70_v40 = vrot.slane %v69_v25, 2 }
  0x41   :  { %v155_v41 = vmax.f32 %v109_v32, 1e-16  ;;  %v156_v42 = vmax.f32 %v116_v33, 1e-16  ;;  %v77_v43 = vrot.slane %v76_v28, 2  ;;  %v183_v51 = vsub.s32 %v180_v35, %v182_v36 }
  0x42   :  { %v159_v44 = vmax.f32 %v145_v37, 1e-16  ;;  %v160_v45 = vmax.f32 %v152_v38, 1e-16  ;;  %v71_v52 = vadd.f32 %v70_v40, %v69_v25  ;;  %vm380_vm1 = vcmp.lt.s32.totalorder %v181_v21, 256 }
  0x43   :  { %v78_v53 = vadd.f32 %v77_v43, %v76_v28 }
  0x44   :  { %v163_v48 = vmul.f32 %v159_v44, %v155_v41  ;;  %v164_v49 = vmul.f32 %v160_v45, %v156_v42  ;;  %v72_v56 = vrot.slane %v71_v52, 1 }
  0x45   :  { %v242_v34 = vpop.eup %241  ;;  %v79_v58 = vrot.slane %v78_v53, 1 }
  0x46   :  { %v169_v46 = vmul.f32 %v242_v34, %v59_v31  ;;  %v244_v47 = vpop.eup %243  ;;  %245 = vrsqrt.f32 %v163_v48  ;;  %v73_v60 = vadd.f32 %v72_v56, %v71_v52 }
  0x47   :  { %v170_v50 = vmul.f32 %v244_v47, %v66_v39  ;;  %247 = vrsqrt.f32 %v164_v49  ;;  %v80_v61 = vadd.f32 %v79_v58, %v78_v53 }
  0x49   :  { %v177_v54 = vcombine.low %v169_v46, %v170_v50 }
  0x4b   :  { %v184_v55 = vrot.slane %v177_v54, %v183_v51 }
  0x4d   :  { %v191_v59 = vrot.slane %v184_v55, %v183_v51 }
  0x4f   :  { %213 = vst.msk [vmem:[#allocation7] sm:$0x3] %vm380_vm1, %v191_v59 }
  0x50   :  { %v246_v62 = vpop.eup %245 }
  0x51   :  { %v248_v63 = vpop.eup %247  ;;  %v171_v0 = vmul.f32 %v246_v62, %v73_v60 }
  0x52   :  { %v172_v1 = vmul.f32 %v248_v63, %v80_v61 }
  0x54   :  { %v192_v2 = vcombine.low %v171_v0, %v172_v1 }
  0x56   :  { %v199_v3 = vrot.slane %v192_v2, %v183_v51 }
  0x58   :  { %v206_v4 = vrot.slane %v199_v3, %v183_v51 }
  0x5a   :  { %214 = vst.msk [vmem:[#allocation7 + $0x2] sm:$0x3] %vm380_vm1, %v206_v4 }
  0x5b   :  { %304 = shalt.err (!%p301_p6)
}
  0x5c   :  { %s305_s10 = scalar_lea.hbm %s402_s2, 64 }
  0x5d   :  { %p306_p7 = scmp.ne.s32.totalorder %s402_s2, %s305_s10  ;;  %p309_p8 = scmp.lt.u32.totalorder %s305_s10, %s402_s2 }
  0x5f   :  { %p311_p9 = pnand %p309_p8, %p306_p7 }
  0x61   :  { %314 = shalt.err (!%p311_p9)
}
  0x62   :  { %s327_s15 = smov 32   ;;  %s328_s16 = smov 2  }
  0x63   :  { %226 = dma.vmem_to_hbm [thread:$0]  %s221_s6, 64, %s402_s2, [#allocation4], %s327_s15, %s327_s15, %s328_s16  }
  0x64   :  { %319 = dma.done.wait [#allocation4], 64  }
  0x65   :  { %320 = vsyncadd [#allocation4], 4294967232 }
  0x66   :  { %230 = vsyncpa [#allocation3], 1 }
  0x67   :  { %231 = vsyncpa [#allocation6], 1 }
  0x68   :  { %232 = vsyncpa [#allocation4], 1 }

</bundles_post_ra>
